<compile_context>
chip_gen: v5e
topology: v5e:2x2
jax: 0.10.0
libtpu: 0.0.40
codegen_flags: <defaults>
</compile_context>

<pallas_src>
import functools

import jax
import jax.numpy as jnp
from jax.experimental import pallas as pl
from jax.experimental.pallas import tpu as pltpu

_LANE = 128      # vreg lane width
_SUBLANE = 8     # f32 sublanes per vreg
_DEFAULT_TILE_ROWS = 512


def _round_up(n, m):
    return ((n + m - 1) // m) * m


def _actor_critic_kernel(x_ref, w1_ref, b1_ref, w23_ref, b23_ref, out_ref, *,
                         num_actions):
    x = x_ref[...]                                                  # (TB, K)

    # common = leaky_relu(x @ W1 + b1)   (K is unpadded; MXU pads internally)
    h = jnp.dot(x, w1_ref[...], preferred_element_type=jnp.float32) + b1_ref[...]
    common = jnp.maximum(h, 0.01 * h)                               # (TB, Hp)

    # Fused heads: lane 0 = value, lanes 1..A = policy logits, rest zero-pad.
    fused = jnp.dot(common, w23_ref[...],
                    preferred_element_type=jnp.float32) + b23_ref[...]   # (TB, 128)

    lane = jax.lax.broadcasted_iota(jnp.int32, fused.shape, dimension=1)
    policy_lanes = jnp.logical_and(lane >= 1, lane <= num_actions)

    # Softmax over the real action lanes only (padding lanes masked out).
    logits = jnp.where(policy_lanes, fused, jnp.float32(-1e30))
    m = jnp.max(logits, axis=1, keepdims=True)
    e = jnp.where(policy_lanes, jnp.exp(logits - m), jnp.float32(0.0))
    denom = jnp.sum(e, axis=1, keepdims=True)
    # EUP reciprocal + one Newton step to hold ~1e-7 relative error.
    inv = pl.reciprocal(denom, approx=True)
    inv = inv * (2.0 - denom * inv)
    policy = e * inv

    # Single lane-dense output slab: value in lane 0, policy in lanes 1..A,
    # zeros elsewhere (policy is already 0 on padding lanes).
    out_ref[...] = jnp.where(lane == 0, fused, policy)


def prepare_params(w1, b1, w2, b2, w3, b3):
    """One-time layout plumbing: fuse the two heads, pad hidden to 128 lanes."""
    num_inputs, hidden = w1.shape
    num_actions = w3.shape[1]
    # Fused head (1 + num_actions columns) must fit a single 128-lane slab.
    assert 1 + num_actions <= _LANE  # TODO(synk): tile the head if A >= 128

    hp = _round_up(hidden, _LANE)

    # Keep the input feature dim unpadded (K=num_inputs); only pad hidden.
    w1_pad = jnp.zeros((num_inputs, hp), jnp.float32).at[:, :hidden].set(
        w1.astype(jnp.float32))
    b1_pad = jnp.zeros((1, hp), jnp.float32).at[:, :hidden].set(
        jnp.reshape(b1, (1, hidden)).astype(jnp.float32))

    w23 = jnp.concatenate([w2.astype(jnp.float32), w3.astype(jnp.float32)], axis=1)
    b23 = jnp.concatenate([jnp.reshape(b2, (1, 1)).astype(jnp.float32),
                           jnp.reshape(b3, (1, num_actions)).astype(jnp.float32)],
                          axis=1)
    w23_pad = jnp.zeros((hp, _LANE), jnp.float32).at[:hidden, :1 + num_actions].set(w23)
    b23_pad = jnp.zeros((1, _LANE), jnp.float32).at[:, :1 + num_actions].set(b23)

    return {
        "w1": w1_pad, "b1": b1_pad, "w23": w23_pad, "b23": b23_pad,
        "num_inputs": num_inputs, "num_actions": num_actions,
    }


def common_actor_critic_forward(x, params, *, tile_rows=_DEFAULT_TILE_ROWS):
    """x: (B, num_inputs) float32. Returns (value (B,1), policy (B, num_actions))."""
    B, num_inputs = x.shape
    assert num_inputs == params["num_inputs"]
    num_actions = params["num_actions"]

    # Batch tile size: multiple of 8 sublanes, capped at tile_rows.
    tb = min(_round_up(tile_rows, _SUBLANE), _round_up(max(B, 1), _SUBLANE))
    bp = _round_up(max(B, 1), tb)
    n_tiles = bp // tb

    x = x.astype(jnp.float32)
    if bp != B:
        x_in = jnp.zeros((bp, num_inputs), jnp.float32).at[:B].set(x)
    else:
        x_in = x

    hp = params["w1"].shape[1]
    kernel = functools.partial(_actor_critic_kernel, num_actions=num_actions)

    out = pl.pallas_call(
        kernel,
        out_shape=jax.ShapeDtypeStruct((bp, _LANE), jnp.float32),
        grid=(n_tiles,),
        in_specs=[
            pl.BlockSpec((tb, num_inputs), lambda i: (i, 0)),     # x: batch-tiled
            pl.BlockSpec((num_inputs, hp), lambda i: (0, 0)),     # w1: resident
            pl.BlockSpec((1, hp), lambda i: (0, 0)),              # b1: resident
            pl.BlockSpec((hp, _LANE), lambda i: (0, 0)),          # w23: resident
            pl.BlockSpec((1, _LANE), lambda i: (0, 0)),           # b23: resident
        ],
        out_specs=pl.BlockSpec((tb, _LANE), lambda i: (i, 0)),
        compiler_params=pltpu.CompilerParams(
            dimension_semantics=("parallel",)),
    )(x_in, params["w1"], params["b1"], params["w23"], params["b23"])

    value = out[:B, 0:1]
    policy = out[:B, 1:1 + num_actions]
    return value, policy


def _reference(x, w1, b1, w2, b2, w3, b3):
    h = x @ w1 + b1
    common = jnp.where(h >= 0, h, 0.01 * h)
    value = common @ w2 + b2
    policy = jax.nn.softmax(common @ w3 + b3, axis=1)
    return value, policy


if __name__ == "__main__":
    # Small shapes consistent with the module; batch=1 matches the PyTorch
    # forward's state.unsqueeze(0).
    num_inputs, num_actions, hidden_size = 16, 8, 32

    key = jax.random.PRNGKey(0)
    ks = jax.random.split(key, 9)

    # Deterministic synthetic parameters (weights stored as (in, out)).
    w1 = jax.random.normal(ks[0], (num_inputs, hidden_size), jnp.float32) * 0.1
    b1 = jax.random.normal(ks[1], (1, hidden_size), jnp.float32) * 0.1
    w2 = jax.random.normal(ks[2], (hidden_size, 1), jnp.float32) * 0.1
    b2 = jax.random.normal(ks[3], (1, 1), jnp.float32) * 0.1
    w3 = jax.random.normal(ks[4], (hidden_size, num_actions), jnp.float32) * 0.1
    b3 = jax.random.normal(ks[5], (1, num_actions), jnp.float32) * 0.1

    params = prepare_params(w1, b1, w2, b2, w3, b3)

    # --- single-state forward (B = 1, like the PyTorch module) -------------
    state = jax.random.normal(ks[6], (num_inputs,), jnp.float32)
    x = state[None, :]
    value, policy = common_actor_critic_forward(x, params)
    jax.block_until_ready((value, policy))

    v_ref, p_ref = _reference(x, w1, b1, w2, b2, w3, b3)
    assert value.shape == (1, 1) and policy.shape == (1, num_actions)
    assert jnp.allclose(value, v_ref, atol=1e-5, rtol=1e-5)
    assert jnp.allclose(policy, p_ref, atol=1e-5, rtol=1e-5)
    assert jnp.allclose(jnp.sum(policy, axis=1), 1.0, atol=1e-5)

    # --- batched forward (stacked rollout states, single tile) -------------
    xb = jax.random.normal(ks[7], (16, num_inputs), jnp.float32)
    vb, pb = common_actor_critic_forward(xb, params)
    jax.block_until_ready((vb, pb))
    vb_ref, pb_ref = _reference(xb, w1, b1, w2, b2, w3, b3)
    assert vb.shape == (16, 1) and pb.shape == (16, num_actions)
    assert jnp.allclose(vb, vb_ref, atol=1e-5, rtol=1e-5)
    assert jnp.allclose(pb, pb_ref, atol=1e-5, rtol=1e-5)
    assert jnp.allclose(jnp.sum(pb, axis=1), 1.0, atol=1e-5)

    # --- batched forward exercising multiple grid tiles + ragged batch ------
    xg = jax.random.normal(ks[8], (40, num_inputs), jnp.float32)
    vg, pg = common_actor_critic_forward(xg, params, tile_rows=8)   # grid=(5,)
    jax.block_until_ready((vg, pg))
    vg_ref, pg_ref = _reference(xg, w1, b1, w2, b2, w3, b3)
    assert vg.shape == (40, 1) and pg.shape == (40, num_actions)
    assert jnp.allclose(vg, vg_ref, atol=1e-5, rtol=1e-5)
    assert jnp.allclose(pg, pg_ref, atol=1e-5, rtol=1e-5)
    assert jnp.allclose(jnp.sum(pg, axis=1), 1.0, atol=1e-5)

    print("KERNEL_OK")
</pallas_src>

<mosaic_0001>
module attributes {stable_mosaic.version = 11 : i64} {
  func.func @_actor_critic_kernel(%arg0: i32, %arg1: memref<8x16xf32, #tpu.memory_space<vmem>>, %arg2: memref<16x128xf32, #tpu.memory_space<vmem>>, %arg3: memref<1x128xf32, #tpu.memory_space<vmem>>, %arg4: memref<128x128xf32, #tpu.memory_space<vmem>>, %arg5: memref<1x128xf32, #tpu.memory_space<vmem>>, %arg6: memref<8x128xf32, #tpu.memory_space<vmem>>) attributes {dimension_semantics = [#tpu.dimension_semantics<parallel>], iteration_bounds = array<i64: 1>, scalar_prefetch = 0 : i64, scratch_operands = 0 : i64, tpu.core_type = #tpu.core_type<tc>, window_params = [{transform_indices = @transform_0, window_bounds = array<i64: 8, 16>}, {pipeline_mode = #tpu.pipeline_mode<synchronous>, transform_indices = @transform_1, window_bounds = array<i64: 16, 128>}, {pipeline_mode = #tpu.pipeline_mode<synchronous>, transform_indices = @transform_2, window_bounds = array<i64: 1, 128>}, {pipeline_mode = #tpu.pipeline_mode<synchronous>, transform_indices = @transform_3, window_bounds = array<i64: 128, 128>}, {pipeline_mode = #tpu.pipeline_mode<synchronous>, transform_indices = @transform_4, window_bounds = array<i64: 1, 128>}, {transform_indices = @transform_5, window_bounds = array<i64: 8, 128>}]} {
    %c0 = arith.constant 0 : index
    %c0_0 = arith.constant 0 : index
    %0 = vector.load %arg1[%c0, %c0_0] : memref<8x16xf32, #tpu.memory_space<vmem>>, vector<8x16xf32>
    %c0_1 = arith.constant 0 : index
    %c0_2 = arith.constant 0 : index
    %1 = vector.load %arg2[%c0_1, %c0_2] : memref<16x128xf32, #tpu.memory_space<vmem>>, vector<16x128xf32>
    %cst = arith.constant dense<0.000000e+00> : vector<8x128xf32>
    %2 = tpu.matmul %0, %1, %cst {dimension_numbers = #tpu.dot_dimension_numbers<[1], [0], [0], [1], [0, 0, 1, 1], [], []>} : vector<8x16xf32>, vector<16x128xf32>, vector<8x128xf32> -> vector<8x128xf32>
    %c0_3 = arith.constant 0 : index
    %c0_4 = arith.constant 0 : index
    %3 = vector.load %arg3[%c0_3, %c0_4] : memref<1x128xf32, #tpu.memory_space<vmem>>, vector<1x128xf32>
    %4 = vector.broadcast %3 : vector<1x128xf32> to vector<8x128xf32>
    %5 = arith.addf %2, %4 : vector<8x128xf32>
    %cst_5 = arith.constant 0.00999999977 : f32
    %6 = vector.broadcast %cst_5 : f32 to vector<8x128xf32>
    %7 = arith.mulf %6, %5 : vector<8x128xf32>
    %8 = arith.maximumf %5, %7 : vector<8x128xf32>
    %c0_6 = arith.constant 0 : index
    %c0_7 = arith.constant 0 : index
    %9 = vector.load %arg4[%c0_6, %c0_7] : memref<128x128xf32, #tpu.memory_space<vmem>>, vector<128x128xf32>
    %cst_8 = arith.constant dense<0.000000e+00> : vector<8x128xf32>
    %10 = tpu.matmul %8, %9, %cst_8 {dimension_numbers = #tpu.dot_dimension_numbers<[1], [0], [0], [1], [0, 0, 1, 1], [], []>} : vector<8x128xf32>, vector<128x128xf32>, vector<8x128xf32> -> vector<8x128xf32>
    %c0_9 = arith.constant 0 : index
    %c0_10 = arith.constant 0 : index
    %11 = vector.load %arg5[%c0_9, %c0_10] : memref<1x128xf32, #tpu.memory_space<vmem>>, vector<1x128xf32>
    %12 = vector.broadcast %11 : vector<1x128xf32> to vector<8x128xf32>
    %13 = arith.addf %10, %12 : vector<8x128xf32>
    %14 = tpu.iota {dimensions = array<i32: 1>} : vector<8x128xi32>
    %c1_i32 = arith.constant 1 : i32
    %15 = vector.broadcast %c1_i32 : i32 to vector<8x128xi32>
    %16 = arith.cmpi sge, %14, %15 : vector<8x128xi32>
    %c8_i32 = arith.constant 8 : i32
    %17 = vector.broadcast %c8_i32 : i32 to vector<8x128xi32>
    %18 = arith.cmpi sle, %14, %17 : vector<8x128xi32>
    %19 = arith.andi %16, %18 : vector<8x128xi1>
    %cst_11 = arith.constant -1.000000e+30 : f32
    %20 = vector.broadcast %cst_11 : f32 to vector<8x128xf32>
    %21 = arith.select %19, %13, %20 : vector<8x128xi1>, vector<8x128xf32>
    %cst_12 = arith.constant dense<0xFF800000> : vector<8xf32>
    %22 = vector.multi_reduction <maximumf>, %21, %cst_12 [1] : vector<8x128xf32> to vector<8xf32>
    %23 = vector.shape_cast %22 : vector<8xf32> to vector<8x1xf32>
    %24 = vector.broadcast %23 : vector<8x1xf32> to vector<8x128xf32>
    %25 = arith.subf %21, %24 : vector<8x128xf32>
    %26 = math.exp %25 : vector<8x128xf32>
    %cst_13 = arith.constant 0.000000e+00 : f32
    %27 = vector.broadcast %cst_13 : f32 to vector<8x128xf32>
    %28 = arith.select %19, %26, %27 : vector<8x128xi1>, vector<8x128xf32>
    %cst_14 = arith.constant dense<0.000000e+00> : vector<8xf32>
    %29 = vector.multi_reduction <add>, %28, %cst_14 [1] : vector<8x128xf32> to vector<8xf32>
    %30 = vector.shape_cast %29 : vector<8xf32> to vector<8x1xf32>
    %31 = tpu.reciprocal %30 {approx = true} : vector<8x1xf32> -> vector<8x1xf32>
    %32 = arith.mulf %30, %31 : vector<8x1xf32>
    %cst_15 = arith.constant 2.000000e+00 : f32
    %33 = vector.broadcast %cst_15 : f32 to vector<8x1xf32>
    %34 = arith.subf %33, %32 : vector<8x1xf32>
    %35 = arith.mulf %31, %34 : vector<8x1xf32>
    %36 = vector.broadcast %35 : vector<8x1xf32> to vector<8x128xf32>
    %37 = arith.mulf %28, %36 : vector<8x128xf32>
    %c0_i32 = arith.constant 0 : i32
    %38 = vector.broadcast %c0_i32 : i32 to vector<8x128xi32>
    %39 = arith.cmpi eq, %14, %38 : vector<8x128xi32>
    %40 = arith.select %39, %13, %37 : vector<8x128xi1>, vector<8x128xf32>
    %c0_16 = arith.constant 0 : index
    %c0_17 = arith.constant 0 : index
    %41 = vector.load %arg6[%c0_16, %c0_17] : memref<8x128xf32, #tpu.memory_space<vmem>>, vector<8x128xf32>
    tpu.vector_store %arg6[%c0_16, %c0_17], %40 {strides = array<i32>} : memref<8x128xf32, #tpu.memory_space<vmem>>, vector<8x128xf32>,
    return
  }
  func.func @transform_0(%arg0: i32) -> (i32, i32) {
    %c0_i32 = arith.constant 0 : i32
    %c0_i32_0 = arith.constant 0 : i32
    return %arg0, %c0_i32 : i32, i32
  }
  func.func @transform_1(%arg0: i32) -> (i32, i32) {
    %c0_i32 = arith.constant 0 : i32
    %c0_i32_0 = arith.constant 0 : i32
    %c0_i32_1 = arith.constant 0 : i32
    return %c0_i32, %c0_i32_0 : i32, i32
  }
  func.func @transform_2(%arg0: i32) -> (i32, i32) {
    %c0_i32 = arith.constant 0 : i32
    %c0_i32_0 = arith.constant 0 : i32
    %c0_i32_1 = arith.constant 0 : i32
    return %c0_i32, %c0_i32_0 : i32, i32
  }
  func.func @transform_3(%arg0: i32) -> (i32, i32) {
    %c0_i32 = arith.constant 0 : i32
    %c0_i32_0 = arith.constant 0 : i32
    %c0_i32_1 = arith.constant 0 : i32
    return %c0_i32, %c0_i32_0 : i32, i32
  }
  func.func @transform_4(%arg0: i32) -> (i32, i32) {
    %c0_i32 = arith.constant 0 : i32
    %c0_i32_0 = arith.constant 0 : i32
    %c0_i32_1 = arith.constant 0 : i32
    return %c0_i32, %c0_i32_0 : i32, i32
  }
  func.func @transform_5(%arg0: i32) -> (i32, i32) {
    %c0_i32 = arith.constant 0 : i32
    %c0_i32_0 = arith.constant 0 : i32
    return %arg0, %c0_i32 : i32, i32
  }
}

</mosaic_0001>

<bundles_post_ra>
// kernel: tpu_custom_call.1
= control target key start
LH: loop header
LB: loop body
LE: loop exit
PB: predicated region body
PF: predicated region fallthrough
CT: control target
= control target key end

     0   :  { %10 = vsyncpa [#allocation3], 0  ;;  %s348_s0 = inlined_call_operand.hbm [shape: f32[8,16], index: 0, kind: input, shape index: {}]   ;;  %s349_s1 = inlined_call_operand.hbm [shape: f32[16,128], index: 1, kind: input, shape index: {}]   ;;  %s350_s2 = inlined_call_operand.vmem [shape: f32[1,128], index: 2, kind: input, shape index: {}]   ;;  %s351_s3 = inlined_call_operand.hbm [shape: f32[128,128], index: 3, kind: input, shape index: {}]   ;;  %s352_s4 = inlined_call_operand.vmem [shape: f32[1,128], index: 4, kind: input, shape index: {}]   ;;  %s353_s5 = inlined_call_operand.hbm [shape: f32[8,128], index: 5, kind: output, shape index: {}]  }
   0x1   :  { %11 = vsyncpa [#allocation6], 0  ;;  %s28_s20 = sshll.u32 %s349_s1, 4  ;;  %s29_s20 = int_to_ptr.hbm [resolvable:$true] %s28_s20 }
   0x2   :  { %12 = vsyncpa [#allocation4], 0  ;;  %s294_s21 = smov [#allocation5]   ;;  %s18_s25 = sshll.u32 %s348_s0, 4  ;;  %s19_s25 = int_to_ptr.hbm [resolvable:$true] %s18_s25 }
   0x3   :  { %s30_s22 = sshll.u32 %s294_s21, 4  ;;  %s295_s26 = smov 128   ;;  %s31_s22 = int_to_ptr.vmem [resolvable:$true] %s30_s22 }
   0x4   :  { %s296_s27 = smov 8   ;;  %s297_s28 = smov [#allocation2]  }
   0x5   :  { %36 = dma.hbm_to_vmem [thread:$0]  %s29_s20, 256, %s31_s22, [#allocation6], %s295_s26, %s295_s26, %s296_s27  }
   0x6   :  { %s20_s29 = sshll.u32 %s297_s28, 4  ;;  %s43_s7 = sshll.u32 %s351_s3, 4  ;;  %s21_s29 = int_to_ptr.vmem [resolvable:$true] %s20_s29  ;;  %s44_s7 = int_to_ptr.hbm [resolvable:$true] %s43_s7 }
   0x7   :  { %23 = dma.hbm_to_vmem [thread:$0]  %s19_s25, 128, %s21_s29, [#allocation3]  }
   0x8   :  { %s298_s1 = smov [#allocation7]  }
   0x9   :  { %s45_s8 = sshll.u32 %s298_s1, 4  ;;  %s46_s8 = int_to_ptr.vmem [resolvable:$true] %s45_s8 }
   0xa   :  { %51 = dma.hbm_to_vmem [thread:$0]  %s44_s7, 2048, %s46_s8, [#allocation6], %s295_s26, %s295_s26, %s296_s27  }
   0xb   :  { %288 = dma.done.wait [#allocation3], 128  }
   0xc   :  { %289 = vsyncadd [#allocation3], 4294967168 }
   0xd   :  { %290 = dma.done.wait [#allocation6], 2304  }
   0xe   :  { %291 = vsyncadd [#allocation6], 4294964992  ;;  %v68_v0 = vld [vmem:[#allocation5 + $0x8] sm:$0xff]  ;;  %v67_v1 = vld [vmem:[#allocation5] sm:$0xff]  ;;  %vm73_vm0 = vcmask 130048   ;;  %v139_v24 = vlaneseq  ;;  %s168_s13 = sshll.u32 %s353_s5, 4  ;;  %s169_s13 = int_to_ptr.hbm [resolvable:$true] %s168_s13 }
   0xf   :  { %91 = vmatpush.msra.mxu0 %v68_v0  ;;  %v66_v2 = vld [vmem:[#allocation2] sm:$0xff]  ;;  %v114_v3 = vld [vmem:[#allocation7 + $0x78] sm:$0xff]  ;;  %v113_v4 = vld [vmem:[#allocation7 + $0x70] sm:$0xff] }
  0x10   :  { %119 = vmatpush.msra.mxu1 %v114_v3  ;;  %v112_v5 = vld [vmem:[#allocation7 + $0x68] sm:$0xff]  ;;  %v111_v6 = vld [vmem:[#allocation7 + $0x60] sm:$0xff]  ;;  %v110_v7 = vld [vmem:[#allocation7 + $0x58] sm:$0xff]  ;;  %v140_v25 = vand.u32 127, %v139_v24 }
  0x11   :  { %92 = vmatpush.msra.mxu0 %v67_v1  ;;  %v109_v8 = vld [vmem:[#allocation7 + $0x50] sm:$0xff]  ;;  %v108_v9 = vld [vmem:[#allocation7 + $0x48] sm:$0xff]  ;;  %v107_v10 = vld [vmem:[#allocation7 + $0x40] sm:$0xff] }
  0x12   :  { %179 = vmatmul.msk.f32.vlgmr.msra.gmra.mxu0 %vm73_vm0, %v66_v2  ;;  %120 = vmatpush.msra.mxu1 %v113_v4  ;;  %v106_v11 = vld [vmem:[#allocation7 + $0x38] sm:$0xff]  ;;  %v105_v12 = vld [vmem:[#allocation7 + $0x30] sm:$0xff]  ;;  %v104_v13 = vld [vmem:[#allocation7 + $0x28] sm:$0xff]  ;;  %vm141_vm1 = vcmp.ge.s32.totalorder %v140_v25, 1  ;;  %vm142_vm2 = vcmp.le.s32.totalorder %v140_v25, 8  ;;  %vm158_vm4 = vcmp.eq.s32.totalorder %v140_v25, 0 }
  0x13   :  { %v103_v14 = vld [vmem:[#allocation7 + $0x20] sm:$0xff]  ;;  %v102_v15 = vld [vmem:[#allocation7 + $0x18] sm:$0xff]  ;;  %v101_v16 = vld [vmem:[#allocation7 + $0x10] sm:$0xff] }
  0x14   :  { %121 = vmatpush.msra.mxu1 %v112_v5  ;;  %v100_v17 = vld [vmem:[#allocation7 + $0x8] sm:$0xff]  ;;  %v99_v18 = vld [vmem:[#allocation7] sm:$0xff]  ;;  %vm143_vm3 = vmand %vm141_vm1, %vm142_vm2 }
  0x15   :  { %v186_v19 = vld [vmem:[%s350_s2] ss:$0 sm:$0xff]  ;;  %s299_s2 = smov [#allocation8]  }
  0x16   :  { %122 = vmatpush.msra.mxu1 %v111_v6  ;;  %v187_v26 = vld [vmem:[%s352_s4] ss:$0 sm:$0xff]  ;;  %s166_s4 = sshll.u32 %s299_s2, 4  ;;  %s167_s4 = int_to_ptr.vmem [resolvable:$true] %s166_s4 }
  0x18   :  { %123 = vmatpush.msra.mxu1 %v110_v7 }
  0x1a   :  { %124 = vmatpush.msra.mxu1 %v109_v8 }
  0x1c   :  { %125 = vmatpush.msra.mxu1 %v108_v9 }
  0x1e   :  { %126 = vmatpush.msra.mxu1 %v107_v10 }
  0x20   :  { %127 = vmatpush.msra.mxu1 %v106_v11 }
  0x22   :  { %128 = vmatpush.msra.mxu1 %v105_v12 }
  0x24   :  { %129 = vmatpush.msra.mxu1 %v104_v13 }
  0x26   :  { %130 = vmatpush.msra.mxu1 %v103_v14 }
  0x28   :  { %131 = vmatpush.msra.mxu1 %v102_v15 }
  0x2a   :  { %132 = vmatpush.msra.mxu1 %v101_v16 }
  0x2c   :  { %133 = vmatpush.msra.mxu1 %v100_v17 }
  0x2e   :  { %134 = vmatpush.msra.mxu1 %v99_v18 }
  0x8f   :  { %v94_v20 = vpop.f32.mrf.mxu0 }
  0x90   :  { %v95_v21 = vadd.f32 %v186_v19, %v94_v20 }
  0x92   :  { %v97_v22 = vmul.f32 0.01, %v95_v21 }
  0x94   :  { %v98_v23 = vmax.f32 %v95_v21, %v97_v22 }
  0x96   :  { %135 = vmatmul.f32.vlgmr.msra.gmra.mxu1 %v98_v23 }
 0x113   :  { %v136_v27 = vpop.f32.mrf.mxu1 }
 0x114   :  { %v137_v28 = vadd.f32 %v187_v26, %v136_v27 }
 0x116   :  { %v144_v29 = vsel %vm143_vm3, %v137_v28, -1e+30 }
 0x117   :  { %145 = vmax.xlane.f32.xlu0 %v144_v29 }
 0x18a   :  { %v146_v30 = vpop.xlane.xlu0 %145 }
 0x18b   :  { %v147_v31 = vsub.f32 %v144_v29, %v146_v30 }
 0x18d   :  { %v148_v32 = vmul.f32 1.442695, %v147_v31 }
 0x18f   :  { %188 = vpow2.f32 %v148_v32 }
 0x195   :  { %v189_v33 = vpop.eup %188 }
 0x196   :  { %v150_v34 = vsel %vm143_vm3, %v189_v33, 0.0 }
 0x197   :  { %151 = vadd.xlane.f32.xlu0 %v150_v34 }
 0x20a   :  { %v152_v35 = vpop.xlane.xlu0 %151 }
 0x20b   :  { %190 = vrcp.f32 %v152_v35 }
 0x211   :  { %v191_v36 = vpop.eup %190 }
 0x212   :  { %v154_v37 = vmul.f32 %v191_v36, %v152_v35 }
 0x214   :  { %v155_v38 = vsub.f32 2.0, %v154_v37 }
 0x216   :  { %v156_v39 = vmul.f32 %v191_v36, %v155_v38 }
 0x218   :  { %v157_v40 = vmul.f32 %v156_v39, %v150_v34 }
 0x21a   :  { %v159_v41 = vsel %vm158_vm4, %v137_v28, %v157_v40 }
 0x21b   :  { %160 = vst [vmem:[#allocation8] sm:$0xff] %v159_v41 }
 0x21c   :  { %171 = dma.vmem_to_hbm [thread:$0]  %s167_s4, 128, %s169_s13, [#allocation4]  }
 0x21d   :  { %292 = dma.done.wait [#allocation4], 128  }
 0x21e   :  { %293 = vsyncadd [#allocation4], 4294967168 }
 0x21f   :  { %176 = vsyncpa [#allocation3], 1 }
 0x220   :  { %177 = vsyncpa [#allocation6], 1 }
 0x221   :  { %178 = vsyncpa [#allocation4], 1 }

</bundles_post_ra>
